<compile_context>
chip_gen: v5e
topology: v5e:2x2
jax: 0.10.0
libtpu: 0.0.40
codegen_flags: <defaults>
</compile_context>

<pallas_src>
import functools

import jax
import jax.numpy as jnp
from jax.experimental import pallas as pl
from jax.experimental.pallas import tpu as pltpu

LANE = 128  # routing-logit block is padded to a full lane group so the transform block
            # begins at a 128-lane boundary.


def capsule_kernel(x_ref, wcat_ref, expand_ref, out_ref, *, num_capsules, pad):
    # x_ref      : [TB, F]          (f32)
    # wcat_ref   : [F, pad + C*O]   (cols 0:C = route_weights^T, cols pad: = W flattened)
    # expand_ref : [C, C*O]         (one-hot expansion: expand[c, c*O + o] = 1)
    # out_ref    : [TB, C*O]        (lane-dense output slab)
    x = x_ref[...]

    # ---- one fused MXU pass: [routing logits | per-capsule transforms] ----
    res = jnp.dot(x, wcat_ref[...], preferred_element_type=jnp.float32)  # [TB, pad + C*O]
    logits = res[:, :num_capsules]   # [TB, C]   (lane offset 0)
    t = res[:, pad:]                 # [TB, C*O] (starts at a 128-lane boundary)

    # NaN guard (torch.nan_to_num(transformed, nan=0.0) branch); no-op for finite inputs.
    # TODO(synk): torch also clamps +/-inf when NaNs are present; that edge case is omitted.
    t = jnp.where(jnp.isnan(t), jnp.zeros_like(t), t)

    # ---- softmax over capsules (RoutingLayer) ----
    m = jnp.max(logits, axis=1, keepdims=True)
    e = jnp.exp(logits - m)
    inv = pl.reciprocal(jnp.sum(e, axis=1, keepdims=True), approx=True)  # EUP slot
    attn = e * inv                   # [TB, C]

    # ---- broadcast attention per-capsule across its O output lanes (tiny MXU pass) ----
    attn_rep = jnp.dot(attn, expand_ref[...], preferred_element_type=jnp.float32)  # [TB, C*O]

    out_ref[...] = (attn_rep * t).astype(out_ref.dtype)


def capsule_layer(x, route_weights, W, *, block_b=256):
    """x: [B, in_features], route_weights: [C, in_features], W: [C, in_features, out_features]
    returns capsules: [B, C, out_features]"""
    B, F = x.shape
    C, F2, O = W.shape
    assert F2 == F and route_weights.shape == (C, F)
    assert C <= LANE, "num_capsules must fit in one lane group"

    x = x.astype(jnp.float32)
    pad = LANE

    # [F, pad]: routing weights (transposed) in the first C lanes, zeros elsewhere.
    rw_t = jnp.zeros((F, pad), jnp.float32).at[:, :C].set(route_weights.T.astype(jnp.float32))
    # W: [C, F, O] -> [F, C, O] -> [F, C*O] so column c*O + o holds W[c, :, o].
    w_flat = jnp.transpose(W, (1, 0, 2)).reshape(F, C * O).astype(jnp.float32)
    w_cat = jnp.concatenate([rw_t, w_flat], axis=1)                      # [F, pad + C*O]

    # One-hot expansion matrix: repeats attn[:, c] across that capsule's O lanes.
    expand = jnp.repeat(jnp.eye(C, dtype=jnp.float32), O, axis=1)        # [C, C*O]

    tb = min(B, block_b)
    grid = (pl.cdiv(B, tb),)

    cost = pl.CostEstimate(
        flops=2 * B * F * (pad + C * O) + 2 * B * C * (C * O),
        transcendentals=B * C,
        bytes_accessed=4 * (B * F + F * (pad + C * O) + C * C * O + B * C * O),
    )

    out_flat = pl.pallas_call(
        functools.partial(capsule_kernel, num_capsules=C, pad=pad),
        out_shape=jax.ShapeDtypeStruct((B, C * O), jnp.float32),
        grid=grid,
        in_specs=[
            pl.BlockSpec((tb, F), lambda i: (i, 0)),
            pl.BlockSpec((F, pad + C * O), lambda i: (0, 0)),   # VMEM-resident across grid
            pl.BlockSpec((C, C * O), lambda i: (0, 0)),         # VMEM-resident across grid
        ],
        out_specs=pl.BlockSpec((tb, C * O), lambda i: (i, 0)),
        compiler_params=pltpu.CompilerParams(dimension_semantics=("parallel",)),
        cost_estimate=cost,
    )(x, w_cat, expand)

    return out_flat.reshape(B, C, O)


def capsule_layer_ref(x, route_weights, W):
    """Pure-JAX reference matching the PyTorch forward."""
    logits = x @ route_weights.T
    attn = jax.nn.softmax(logits, axis=1)
    transformed = jnp.einsum('bf,cfo->bco', x, W)
    return attn[:, :, None] * transformed


if __name__ == "__main__":
    # Small shapes consistent with the module: x is [batch, in_features].
    batch = 8
    num_capsules = 4
    in_features = 32
    out_features = 16

    key = jax.random.PRNGKey(0)
    kx, krw, kw = jax.random.split(key, 3)
    x = jax.random.normal(kx, (batch, in_features), dtype=jnp.float32)
    route_weights = jax.random.normal(krw, (num_capsules, in_features), dtype=jnp.float32)
    W = jax.random.normal(kw, (num_capsules, in_features, out_features), dtype=jnp.float32)

    out = capsule_layer(x, route_weights, W)
    jax.block_until_ready(out)

    ref = capsule_layer_ref(x, route_weights, W)
    assert out.shape == (batch, num_capsules, out_features)
    # tolerance accounts for the approx (EUP) reciprocal in the softmax denominator
    assert jnp.allclose(out, ref, atol=5e-3, rtol=5e-3), float(jnp.max(jnp.abs(out - ref)))

    print("KERNEL_OK")
</pallas_src>

<mosaic_0001>
module attributes {stable_mosaic.version = 11 : i64} {
  func.func @capsule_kernel(%arg0: i32, %arg1: memref<8x32xf32, #tpu.memory_space<vmem>>, %arg2: memref<32x192xf32, #tpu.memory_space<vmem>>, %arg3: memref<4x64xf32, #tpu.memory_space<vmem>>, %arg4: memref<8x64xf32, #tpu.memory_space<vmem>>) attributes {dimension_semantics = [#tpu.dimension_semantics<parallel>], iteration_bounds = array<i64: 1>, scalar_prefetch = 0 : i64, scratch_operands = 0 : i64, tpu.core_type = #tpu.core_type<tc>, window_params = [{transform_indices = @transform_0, window_bounds = array<i64: 8, 32>}, {pipeline_mode = #tpu.pipeline_mode<synchronous>, transform_indices = @transform_1, window_bounds = array<i64: 32, 192>}, {pipeline_mode = #tpu.pipeline_mode<synchronous>, transform_indices = @transform_2, window_bounds = array<i64: 4, 64>}, {transform_indices = @transform_3, window_bounds = array<i64: 8, 64>}]} {
    %c0 = arith.constant 0 : index
    %c0_0 = arith.constant 0 : index
    %0 = vector.load %arg1[%c0, %c0_0] : memref<8x32xf32, #tpu.memory_space<vmem>>, vector<8x32xf32>
    %c0_1 = arith.constant 0 : index
    %c0_2 = arith.constant 0 : index
    %1 = vector.load %arg2[%c0_1, %c0_2] : memref<32x192xf32, #tpu.memory_space<vmem>>, vector<32x192xf32>
    %cst = arith.constant dense<0.000000e+00> : vector<8x192xf32>
    %2 = tpu.matmul %0, %1, %cst {dimension_numbers = #tpu.dot_dimension_numbers<[1], [0], [0], [1], [0, 0, 1, 1], [], []>} : vector<8x32xf32>, vector<32x192xf32>, vector<8x192xf32> -> vector<8x192xf32>
    %3 = vector.extract_strided_slice %2 {offsets = [0, 0], sizes = [8, 4], strides = [1, 1]} : vector<8x192xf32> to vector<8x4xf32>
    %4 = vector.extract_strided_slice %2 {offsets = [0, 128], sizes = [8, 64], strides = [1, 1]} : vector<8x192xf32> to vector<8x64xf32>
    %5 = arith.cmpf one, %4, %4 : vector<8x64xf32>
    %cst_3 = arith.constant 0.000000e+00 : f32
    %6 = vector.broadcast %cst_3 : f32 to vector<8x64xf32>
    %7 = arith.select %5, %6, %4 : vector<8x64xi1>, vector<8x64xf32>
    %cst_4 = arith.constant dense<0xFF800000> : vector<8xf32>
    %8 = vector.multi_reduction <maximumf>, %3, %cst_4 [1] : vector<8x4xf32> to vector<8xf32>
    %9 = vector.shape_cast %8 : vector<8xf32> to vector<8x1xf32>
    %10 = vector.broadcast %9 : vector<8x1xf32> to vector<8x4xf32>
    %11 = arith.subf %3, %10 : vector<8x4xf32>
    %12 = math.exp %11 : vector<8x4xf32>
    %cst_5 = arith.constant dense<0.000000e+00> : vector<8xf32>
    %13 = vector.multi_reduction <add>, %12, %cst_5 [1] : vector<8x4xf32> to vector<8xf32>
    %14 = vector.shape_cast %13 : vector<8xf32> to vector<8x1xf32>
    %15 = tpu.reciprocal %14 {approx = true} : vector<8x1xf32> -> vector<8x1xf32>
    %16 = vector.broadcast %15 : vector<8x1xf32> to vector<8x4xf32>
    %17 = arith.mulf %12, %16 : vector<8x4xf32>
    %c0_6 = arith.constant 0 : index
    %c0_7 = arith.constant 0 : index
    %18 = vector.load %arg3[%c0_6, %c0_7] : memref<4x64xf32, #tpu.memory_space<vmem>>, vector<4x64xf32>
    %cst_8 = arith.constant dense<0.000000e+00> : vector<8x64xf32>
    %19 = tpu.matmul %17, %18, %cst_8 {dimension_numbers = #tpu.dot_dimension_numbers<[1], [0], [0], [1], [0, 0, 1, 1], [], []>} : vector<8x4xf32>, vector<4x64xf32>, vector<8x64xf32> -> vector<8x64xf32>
    %20 = arith.mulf %19, %7 : vector<8x64xf32>
    %c0_9 = arith.constant 0 : index
    %c0_10 = arith.constant 0 : index
    %21 = vector.load %arg4[%c0_9, %c0_10] : memref<8x64xf32, #tpu.memory_space<vmem>>, vector<8x64xf32>
    tpu.vector_store %arg4[%c0_9, %c0_10], %20 {strides = array<i32>} : memref<8x64xf32, #tpu.memory_space<vmem>>, vector<8x64xf32>,
    return
  }
  func.func @transform_0(%arg0: i32) -> (i32, i32) {
    %c0_i32 = arith.constant 0 : i32
    %c0_i32_0 = arith.constant 0 : i32
    return %arg0, %c0_i32 : i32, i32
  }
  func.func @transform_1(%arg0: i32) -> (i32, i32) {
    %c0_i32 = arith.constant 0 : i32
    %c0_i32_0 = arith.constant 0 : i32
    %c0_i32_1 = arith.constant 0 : i32
    return %c0_i32, %c0_i32_0 : i32, i32
  }
  func.func @transform_2(%arg0: i32) -> (i32, i32) {
    %c0_i32 = arith.constant 0 : i32
    %c0_i32_0 = arith.constant 0 : i32
    %c0_i32_1 = arith.constant 0 : i32
    return %c0_i32, %c0_i32_0 : i32, i32
  }
  func.func @transform_3(%arg0: i32) -> (i32, i32) {
    %c0_i32 = arith.constant 0 : i32
    %c0_i32_0 = arith.constant 0 : i32
    return %arg0, %c0_i32 : i32, i32
  }
}

</mosaic_0001>

<bundles_post_ra>
// kernel: tpu_custom_call.1
= control target key start
LH: loop header
LB: loop body
LE: loop exit
PB: predicated region body
PF: predicated region fallthrough
CT: control target
= control target key end

     0   :  { %8 = vsyncpa [#allocation3], 0  ;;  %s333_s0 = inlined_call_operand.hbm [shape: f32[8,32], index: 0, kind: input, shape index: {}]   ;;  %s334_s1 = inlined_call_operand.hbm [shape: f32[32,192], index: 1, kind: input, shape index: {}]   ;;  %s335_s2 = inlined_call_operand.hbm [shape: f32[4,64], index: 2, kind: input, shape index: {}]   ;;  %s336_s3 = inlined_call_operand.hbm [shape: f32[8,64], index: 3, kind: output, shape index: {}]  }
   0x1   :  { %9 = vsyncpa [#allocation6], 0  ;;  %s26_s14 = sshll.u32 %s334_s1, 4  ;;  %s27_s14 = int_to_ptr.hbm [resolvable:$true] %s26_s14 }
   0x2   :  { %10 = vsyncpa [#allocation4], 0  ;;  %s290_s15 = smov [#allocation5]   ;;  %s16_s19 = sshll.u32 %s333_s0, 4  ;;  %s17_s19 = int_to_ptr.hbm [resolvable:$true] %s16_s19 }
   0x3   :  { %s28_s16 = sshll.u32 %s290_s15, 4  ;;  %s291_s20 = smov 256   ;;  %s29_s16 = int_to_ptr.vmem [resolvable:$true] %s28_s16 }
   0x4   :  { %s292_s21 = smov 16   ;;  %s293_s22 = smov [#allocation2]  }
   0x5   :  { %34 = dma.hbm_to_vmem [thread:$0]  %s27_s14, 1024, %s29_s16, [#allocation6], %s291_s20, %s291_s20, %s292_s21  }
   0x6   :  { %s18_s23 = sshll.u32 %s293_s22, 4  ;;  %s40_s26 = sshll.u32 %s335_s2, 4  ;;  %s19_s23 = int_to_ptr.vmem [resolvable:$true] %s18_s23  ;;  %s41_s26 = int_to_ptr.hbm [resolvable:$true] %s40_s26 }
   0x7   :  { %21 = dma.hbm_to_vmem [thread:$0]  %s17_s19, 128, %s19_s23, [#allocation3]  }
   0x8   :  { %s294_s1 = smov [#allocation7]  }
   0x9   :  { %s42_s27 = sshll.u32 %s294_s1, 4  ;;  %s43_s27 = int_to_ptr.vmem [resolvable:$true] %s42_s27 }
   0xa   :  { %45 = dma.hbm_to_vmem [thread:$0]  %s41_s26, 64, %s43_s27, [#allocation6]  }
   0xb   :  { %284 = dma.done.wait [#allocation3], 128  }
   0xc   :  { %285 = vsyncadd [#allocation3], 4294967168 }
   0xd   :  { %286 = dma.done.wait [#allocation6], 1088  }
   0xe   :  { %287 = vsyncadd [#allocation6], 4294966208  ;;  %v65_v0 = vld [vmem:[#allocation5 + $0x30] sm:$0xff]  ;;  %v63_v1 = vld [vmem:[#allocation5 + $0x20] sm:$0xff]  ;;  %vm67_vm0 = vcmask 261120   ;;  %vm113_vm1 = vcmask 31744  }
   0xf   :  { %83 = vmatpush.msra.mxu0 %v65_v0  ;;  %v61_v2 = vld [vmem:[#allocation5 + $0x10] sm:$0xff]  ;;  %v59_v3 = vld [vmem:[#allocation5] sm:$0xff]  ;;  %v58_v4 = vld [vmem:[#allocation2] sm:$0xff]  ;;  %vm129_vm2 = vcmask 1043456   ;;  %s295_s0 = smov [#allocation8]   ;;  %s163_s30 = sshll.u32 %s336_s3, 4  ;;  %s164_s30 = int_to_ptr.hbm [resolvable:$true] %s163_s30 }
  0x10   :  { %v66_v12 = vld [vmem:[#allocation5 + $0x38] sm:$0xff]  ;;  %v64_v13 = vld [vmem:[#allocation5 + $0x28] sm:$0xff]  ;;  %v125_v14 = vld [vmem:[#allocation7] sm:$0xf]  ;;  %s161_s2 = sshll.u32 %s295_s0, 4  ;;  %vm154_vm4 = vcmask 523264   ;;  %s162_s2 = int_to_ptr.vmem [resolvable:$true] %s161_s2 }
  0x11   :  { %84 = vmatpush.msra.mxu0 %v63_v1  ;;  %103 = vmatpush.msra.mxu1 %v66_v12  ;;  %v62_v15 = vld [vmem:[#allocation5 + $0x18] sm:$0xff]  ;;  %v60_v16 = vld [vmem:[#allocation5 + $0x8] sm:$0xff] }
  0x12   :  { %176 = vmatpush.msk.msra.mxu2 %vm129_vm2, %v125_v14 }
  0x13   :  { %85 = vmatpush.msra.mxu0 %v61_v2  ;;  %104 = vmatpush.msra.mxu1 %v64_v13 }
  0x15   :  { %86 = vmatpush.msra.mxu0 %v59_v3  ;;  %105 = vmatpush.msra.mxu1 %v62_v15 }
  0x16   :  { %174 = vmatmul.msk.f32.vlgmr.msra.gmra.mxu0 %vm67_vm0, %v58_v4 }
  0x17   :  { %106 = vmatpush.msra.mxu1 %v60_v16 }
  0x18   :  { %175 = vmatmul.msk.f32.vlgmr.msra.gmra.mxu1 %vm67_vm0, %v58_v4 }
  0x93   :  { %v88_v5 = vpop.f32.mrf.mxu0 }
  0x94   :  { %v114_v6 = vsel %vm113_vm1, %v88_v5, -inf }
  0x95   :  { %115 = vmax.xlane.f32.xlu0 %v114_v6  ;;  %v108_v20 = vpop.f32.mrf.mxu1 }
  0x96   :  { %vm111_vm3 = vcmp.ne.f32.partialorder %v108_v20, %v108_v20 }
  0x97   :  { %v112_v21 = vsel %vm111_vm3, 0.0, %v108_v20 }
 0x108   :  { %v116_v7 = vpop.xlane.xlu0 %115 }
 0x109   :  { %v117_v8 = vsub.f32 %v88_v5, %v116_v7 }
 0x10b   :  { %v118_v9 = vmul.f32 1.442695, %v117_v8 }
 0x10d   :  { %184 = vpow2.f32 %v118_v9 }
 0x113   :  { %v185_v10 = vpop.eup %184 }
 0x114   :  { %v120_v11 = vsel %vm113_vm1, %v185_v10, 0.0 }
 0x115   :  { %121 = vadd.xlane.f32.xlu0 %v120_v11 }
 0x188   :  { %v122_v17 = vpop.xlane.xlu0 %121 }
 0x189   :  { %186 = vrcp.f32 %v122_v17 }
 0x18f   :  { %v187_v18 = vpop.eup %186 }
 0x190   :  { %v124_v19 = vmul.f32 %v187_v18, %v185_v10 }
 0x192   :  { %177 = vmatmul.msk.f32.vlgmr.msra.gmra.mxu2 %vm113_vm1, %v124_v19 }
 0x215   :  { %v150_v22 = vpop.f32.mrf.mxu2 }
 0x216   :  { %v153_v23 = vmul.f32 %v150_v22, %v112_v21 }
 0x218   :  { %155 = vst.msk [vmem:[#allocation8] sm:$0xff] %vm154_vm4, %v153_v23 }
 0x219   :  { %166 = dma.vmem_to_hbm [thread:$0]  %s162_s2, 128, %s164_s30, [#allocation4]  }
 0x21a   :  { %288 = dma.done.wait [#allocation4], 128  }
 0x21b   :  { %289 = vsyncadd [#allocation4], 4294967168 }
 0x21c   :  { %171 = vsyncpa [#allocation3], 1 }
 0x21d   :  { %172 = vsyncpa [#allocation6], 1 }
 0x21e   :  { %173 = vsyncpa [#allocation4], 1 }

</bundles_post_ra>
